<compile_context>
chip_gen: v6e
topology: v6e:2x2x1
jax: 0.10.0
libtpu: 0.0.40
codegen_flags: <defaults>
</compile_context>

<pallas_src>
import functools
import math

import jax
import jax.numpy as jnp
from jax.experimental import pallas as pl
from jax.experimental.pallas import tpu as pltpu


def _attention_head_kernel(x_ref, w_ref, b_ref, o_ref, *, use_bf16, approx_recip):
    # x_ref: (TB, S, E)    current batch tile
    # w_ref: (E, 3*Hp)     fused, pre-transposed, 128-padded QKV weight
    #                      (Q columns pre-scaled by 1/sqrt(H))
    # b_ref: (1, 3*Hp)     fused, 128-padded bias (Q part pre-scaled)
    # o_ref: (TB, S, Hp)   padded output (lane-dense store)
    TB, S, E = x_ref.shape
    Hp3 = w_ref.shape[1]
    Hp = Hp3 // 3

    # Fused QKV projection on the flattened (TB*S, E) slab: one MXU matmul.
    x2 = x_ref[...].reshape(TB * S, E)
    qkv = jnp.dot(x2, w_ref[...], preferred_element_type=jnp.float32) + b_ref[...]

    # 128-lane-aligned slices of the padded projection: zero-cost views.
    q = qkv[:, 0 * Hp:1 * Hp].reshape(TB, S, Hp)   # pre-scaled by 1/sqrt(H)
    k = qkv[:, 1 * Hp:2 * Hp].reshape(TB, S, Hp)
    v = qkv[:, 2 * Hp:3 * Hp].reshape(TB, S, Hp)

    mxu_dtype = jnp.bfloat16 if use_bf16 else jnp.float32

    # Batched Q @ K^T (contract over padded head dim; padded cols are zero).
    scores = jnp.einsum(
        "bqh,bkh->bqk", q.astype(mxu_dtype), k.astype(mxu_dtype),
        preferred_element_type=jnp.float32)                      # (TB, S, S)

    # Numerically stable softmax along the last axis (f32 throughout).
    scores_max = jnp.max(scores, axis=-1, keepdims=True)
    exp_scores = jnp.exp(scores - scores_max)
    denom = jnp.sum(exp_scores, axis=-1, keepdims=True)
    if approx_recip:
        weights = exp_scores * pl.reciprocal(denom, approx=True)
    else:
        weights = exp_scores / denom                             # (TB, S, S)

    out = jnp.einsum(
        "bqk,bkh->bqh", weights.astype(mxu_dtype), v.astype(mxu_dtype),
        preferred_element_type=jnp.float32)                      # (TB, S, Hp)

    # Hp is a multiple of 128 -> unmasked, lane-dense store.
    o_ref[...] = out.astype(o_ref.dtype)


def _vmem_capacity_bytes():
    """Per-TensorCore VMEM capacity; conservative fallback if query fails."""
    try:
        info = pltpu.get_tpu_info()
        cap = getattr(info, "vmem_capacity_bytes", None)
        if cap:
            return int(cap)
    except Exception:
        pass
    return 64 * 1024 * 1024  # v7x per-TC VMEM (smallest of v5e/v6e/v7x)


def _num_tensorcores():
    """Best-effort TensorCore-per-device count (2 on v7x, 1 on v5e/v6e)."""
    try:
        dev = jax.devices()[0]
        for attr in ("num_cores", "core_count", "num_cores_per_chip"):
            n = getattr(dev, attr, None)
            if n:
                return max(1, int(n))
    except Exception:
        pass
    return 1


def _choose_batch_tile(B, S, E, Hp, *, budget_bytes, max_tb=None):
    """Largest divisor of B (<= max_tb) whose per-step VMEM working set fits.

    Working set includes double-buffered input/output blocks, the f32 qkv
    intermediate (+ bf16 casts), the scores/exp/weights f32 temporaries
    (+ bf16 weights cast) and the double-buffered weight/bias blocks.
    """
    if max_tb is None:
        max_tb = B
    max_tb = max(1, min(B, max_tb))

    fixed = 2 * (E * 3 * Hp + 3 * Hp) * 4          # weight + bias blocks (x2 buffers)

    def step_bytes(tb):
        rows = tb * S
        total = fixed
        total += 2 * tb * S * E * 4                # input block, double-buffered
        total += 2 * tb * S * Hp * 4               # output block, double-buffered
        total += rows * 3 * Hp * (4 + 2)           # qkv f32 + bf16 q/k/v casts
        total += tb * S * S * (3 * 4 + 2)          # scores/exp/weights f32 + bf16 cast
        return total

    best = 1
    for d in range(1, max_tb + 1):
        if B % d == 0 and step_bytes(d) <= budget_bytes:
            best = d
    return best


def attention_head(hidden_state, wq, bq, wk, bk, wv, bv, *, tb=None,
                   use_bf16_matmul=True, approx_softmax_recip=True):
    """hidden_state: [B, S, E] float32; wq/wk/wv: [H, E]; bq/bk/bv: [H]."""
    B, S, E = hidden_state.shape
    H = wq.shape[0]
    Hp = ((H + 127) // 128) * 128                  # 128-lane-padded head dim
    scale = 1.0 / math.sqrt(H)                     # scale uses the TRUE head dim

    # Fuse, pre-transpose and 128-pad the projection weights once, outside the
    # kernel.  The attention scale is folded into the Q columns so the kernel
    # never scales the (S, S) score matrix.  Padded columns are zero -> they
    # contribute nothing to Q@K^T and produce zero output columns.
    def pad_cols(m):                               # (E, H) -> (E, Hp)
        return jnp.pad(m, ((0, 0), (0, Hp - H)))

    def pad_vec(v):                                # (H,) -> (Hp,)
        return jnp.pad(v, (0, Hp - H))

    w_qkv = jnp.concatenate(
        [pad_cols(wq.T * scale), pad_cols(wk.T), pad_cols(wv.T)], axis=1)      # (E, 3Hp)
    b_qkv = jnp.concatenate(
        [pad_vec(bq * scale), pad_vec(bk), pad_vec(bv)]).reshape(1, 3 * Hp)    # (1, 3Hp)

    # Generation-aware sizing: per-step tile budget and VMEM limit derived
    # from the queried capacity (64 MiB/TC on v7x, 128 MiB on v5e/v6e).
    vmem_cap = _vmem_capacity_bytes()
    budget_bytes = min(vmem_cap // 4, 16 * 1024 * 1024)
    vmem_limit = min((vmem_cap * 3) // 4, 96 * 1024 * 1024)

    n_cores = _num_tensorcores()
    max_tb = pl.cdiv(B, n_cores) if n_cores > 1 else B   # keep >=1 step per core

    if tb is None:
        tb = _choose_batch_tile(B, S, E, Hp, budget_bytes=budget_bytes, max_tb=max_tb)
    assert B % tb == 0, (B, tb)

    kernel = functools.partial(
        _attention_head_kernel,
        use_bf16=use_bf16_matmul,
        approx_recip=approx_softmax_recip,
    )

    out_padded = pl.pallas_call(
        kernel,
        out_shape=jax.ShapeDtypeStruct((B, S, Hp), hidden_state.dtype),
        grid_spec=pltpu.PrefetchScalarGridSpec(
            num_scalar_prefetch=0,
            grid=(B // tb,),
            in_specs=[
                pl.BlockSpec((tb, S, E), lambda i: (i, 0, 0)),     # hidden_state
                pl.BlockSpec((E, 3 * Hp), lambda i: (0, 0)),       # fused W_qkv
                pl.BlockSpec((1, 3 * Hp), lambda i: (0, 0)),       # fused b_qkv
            ],
            out_specs=pl.BlockSpec((tb, S, Hp), lambda i: (i, 0, 0)),
        ),
        compiler_params=pltpu.CompilerParams(
            dimension_semantics=("parallel",),
            vmem_limit_bytes=vmem_limit,
        ),
    )(hidden_state, w_qkv, b_qkv)

    # Drop the (all-zero) padded head columns outside the kernel.
    return out_padded[..., :H] if Hp != H else out_padded


def attention_head_ref(hidden_state, wq, bq, wk, bk, wv, bv):
    """Pure-JAX f32 reference mirroring the PyTorch module."""
    hp = jax.lax.Precision.HIGHEST
    q = jnp.einsum("bse,he->bsh", hidden_state, wq, precision=hp) + bq
    k = jnp.einsum("bse,he->bsh", hidden_state, wk, precision=hp) + bk
    v = jnp.einsum("bse,he->bsh", hidden_state, wv, precision=hp) + bv
    scores = jnp.einsum("bqh,bkh->bqk", q, k, precision=hp) / math.sqrt(q.shape[-1])
    weights = jax.nn.softmax(scores, axis=-1)
    return jnp.einsum("bqk,bkh->bqh", weights, v, precision=hp)


if __name__ == "__main__":
    B, S, E, H = 2, 8, 32, 16  # batch, seq, embed_dim, head_dim

    key = jax.random.PRNGKey(0)
    kx, kwq, kbq, kwk, kbk, kwv, kbv = jax.random.split(key, 7)

    # Deterministic nn.Linear-style init: uniform(-1/sqrt(E), 1/sqrt(E)).
    bound = 1.0 / math.sqrt(E)
    wq = jax.random.uniform(kwq, (H, E), jnp.float32, -bound, bound)
    bq = jax.random.uniform(kbq, (H,), jnp.float32, -bound, bound)
    wk = jax.random.uniform(kwk, (H, E), jnp.float32, -bound, bound)
    bk = jax.random.uniform(kbk, (H,), jnp.float32, -bound, bound)
    wv = jax.random.uniform(kwv, (H, E), jnp.float32, -bound, bound)
    bv = jax.random.uniform(kbv, (H,), jnp.float32, -bound, bound)

    hidden_state = jax.random.normal(kx, (B, S, E), jnp.float32)

    ref = attention_head_ref(hidden_state, wq, bq, wk, bk, wv, bv)

    # Default (fast) path: bf16 MXU inputs + approx EUP reciprocal.
    out = attention_head(hidden_state, wq, bq, wk, bk, wv, bv)
    out = jax.block_until_ready(out)
    assert out.shape == (B, S, H), out.shape
    assert jnp.allclose(out, ref, atol=2e-2, rtol=2e-2), \
        float(jnp.max(jnp.abs(out - ref)))

    # Precision path: f32 MXU + exact reciprocal (tight tolerance).
    out_precise = attention_head(hidden_state, wq, bq, wk, bk, wv, bv,
                                 use_bf16_matmul=False,
                                 approx_softmax_recip=False)
    out_precise = jax.block_until_ready(out_precise)
    assert jnp.allclose(out_precise, ref, atol=2e-3, rtol=2e-3), \
        float(jnp.max(jnp.abs(out_precise - ref)))

    print("KERNEL_OK")
</pallas_src>

<mosaic_0001>
module attributes {stable_mosaic.version = 11 : i64} {
  func.func @_attention_head_kernel(%arg0: i32, %arg1: memref<2x8x32xf32, #tpu.memory_space<vmem>>, %arg2: memref<32x384xf32, #tpu.memory_space<vmem>>, %arg3: memref<1x384xf32, #tpu.memory_space<vmem>>, %arg4: memref<2x8x128xf32, #tpu.memory_space<vmem>>) attributes {dimension_semantics = [#tpu.dimension_semantics<parallel>], iteration_bounds = array<i64: 1>, scalar_prefetch = 0 : i64, scratch_operands = 0 : i64, tpu.core_type = #tpu.core_type<tc>, window_params = [{transform_indices = @transform_0, window_bounds = array<i64: 2, 8, 32>}, {pipeline_mode = #tpu.pipeline_mode<synchronous>, transform_indices = @transform_1, window_bounds = array<i64: 32, 384>}, {pipeline_mode = #tpu.pipeline_mode<synchronous>, transform_indices = @transform_2, window_bounds = array<i64: 1, 384>}, {transform_indices = @transform_3, window_bounds = array<i64: 2, 8, 128>}]} {
    %c0 = arith.constant 0 : index
    %c0_0 = arith.constant 0 : index
    %c0_1 = arith.constant 0 : index
    %0 = vector.load %arg1[%c0, %c0_0, %c0_1] : memref<2x8x32xf32, #tpu.memory_space<vmem>>, vector<2x8x32xf32>
    %1 = vector.shape_cast %0 : vector<2x8x32xf32> to vector<16x32xf32>
    %c0_2 = arith.constant 0 : index
    %c0_3 = arith.constant 0 : index
    %2 = vector.load %arg2[%c0_2, %c0_3] : memref<32x384xf32, #tpu.memory_space<vmem>>, vector<32x384xf32>
    %cst = arith.constant dense<0.000000e+00> : vector<16x384xf32>
    %3 = tpu.matmul %1, %2, %cst {dimension_numbers = #tpu.dot_dimension_numbers<[1], [0], [0], [1], [0, 0, 1, 1], [], []>} : vector<16x32xf32>, vector<32x384xf32>, vector<16x384xf32> -> vector<16x384xf32>
    %c0_4 = arith.constant 0 : index
    %c0_5 = arith.constant 0 : index
    %4 = vector.load %arg3[%c0_4, %c0_5] : memref<1x384xf32, #tpu.memory_space<vmem>>, vector<1x384xf32>
    %5 = vector.broadcast %4 : vector<1x384xf32> to vector<16x384xf32>
    %6 = arith.addf %3, %5 : vector<16x384xf32>
    %7 = vector.extract_strided_slice %6 {offsets = [0, 0], sizes = [16, 128], strides = [1, 1]} : vector<16x384xf32> to vector<16x128xf32>
    %8 = vector.shape_cast %7 : vector<16x128xf32> to vector<2x8x128xf32>
    %9 = vector.extract_strided_slice %6 {offsets = [0, 128], sizes = [16, 128], strides = [1, 1]} : vector<16x384xf32> to vector<16x128xf32>
    %10 = vector.shape_cast %9 : vector<16x128xf32> to vector<2x8x128xf32>
    %11 = vector.extract_strided_slice %6 {offsets = [0, 256], sizes = [16, 128], strides = [1, 1]} : vector<16x384xf32> to vector<16x128xf32>
    %12 = vector.shape_cast %11 : vector<16x128xf32> to vector<2x8x128xf32>
    %13 = arith.truncf %8 : vector<2x8x128xf32> to vector<2x8x128xbf16>
    %14 = arith.truncf %10 : vector<2x8x128xf32> to vector<2x8x128xbf16>
    "tpu.trace_start"() <{level = 10 : i32, message = "bqh,bkh->bqk"}> : () -> ()
    %cst_6 = arith.constant dense<0.000000e+00> : vector<2x8x8xf32>
    %15 = tpu.matmul %13, %14, %cst_6 {dimension_numbers = #tpu.dot_dimension_numbers<[2], [2], [1], [1], [0, 0, 0, 1, 1, 1], [0], [0]>} : vector<2x8x128xbf16>, vector<2x8x128xbf16>, vector<2x8x8xf32> -> vector<2x8x8xf32>
    "tpu.trace_stop"() : () -> ()
    %cst_7 = arith.constant dense<0xFF800000> : vector<2x8xf32>
    %16 = vector.multi_reduction <maximumf>, %15, %cst_7 [2] : vector<2x8x8xf32> to vector<2x8xf32>
    %17 = vector.shape_cast %16 : vector<2x8xf32> to vector<2x8x1xf32>
    %18 = vector.broadcast %17 : vector<2x8x1xf32> to vector<2x8x8xf32>
    %19 = arith.subf %15, %18 : vector<2x8x8xf32>
    %20 = math.exp %19 : vector<2x8x8xf32>
    %cst_8 = arith.constant dense<0.000000e+00> : vector<2x8xf32>
    %21 = vector.multi_reduction <add>, %20, %cst_8 [2] : vector<2x8x8xf32> to vector<2x8xf32>
    %22 = vector.shape_cast %21 : vector<2x8xf32> to vector<2x8x1xf32>
    %23 = tpu.reciprocal %22 {approx = true} : vector<2x8x1xf32> -> vector<2x8x1xf32>
    %24 = vector.broadcast %23 : vector<2x8x1xf32> to vector<2x8x8xf32>
    %25 = arith.mulf %20, %24 : vector<2x8x8xf32>
    %26 = arith.truncf %25 : vector<2x8x8xf32> to vector<2x8x8xbf16>
    %27 = arith.truncf %12 : vector<2x8x128xf32> to vector<2x8x128xbf16>
    "tpu.trace_start"() <{level = 10 : i32, message = "bqk,bkh->bqh"}> : () -> ()
    %cst_9 = arith.constant dense<0.000000e+00> : vector<2x8x128xf32>
    %28 = tpu.matmul %26, %27, %cst_9 {dimension_numbers = #tpu.dot_dimension_numbers<[2], [1], [1], [2], [0, 0, 0, 1, 1, 2], [0], [0]>} : vector<2x8x8xbf16>, vector<2x8x128xbf16>, vector<2x8x128xf32> -> vector<2x8x128xf32>
    "tpu.trace_stop"() : () -> ()
    %c0_10 = arith.constant 0 : index
    %c0_11 = arith.constant 0 : index
    %c0_12 = arith.constant 0 : index
    %29 = vector.load %arg4[%c0_10, %c0_11, %c0_12] : memref<2x8x128xf32, #tpu.memory_space<vmem>>, vector<2x8x128xf32>
    tpu.vector_store %arg4[%c0_10, %c0_11, %c0_12], %28 {strides = array<i32>} : memref<2x8x128xf32, #tpu.memory_space<vmem>>, vector<2x8x128xf32>,
    return
  }
  func.func @transform_0(%arg0: i32) -> (i32, i32, i32) {
    %c0_i32 = arith.constant 0 : i32
    %c0_i32_0 = arith.constant 0 : i32
    %c0_i32_1 = arith.constant 0 : i32
    return %arg0, %c0_i32, %c0_i32_0 : i32, i32, i32
  }
  func.func @transform_1(%arg0: i32) -> (i32, i32) {
    %c0_i32 = arith.constant 0 : i32
    %c0_i32_0 = arith.constant 0 : i32
    %c0_i32_1 = arith.constant 0 : i32
    return %c0_i32, %c0_i32_0 : i32, i32
  }
  func.func @transform_2(%arg0: i32) -> (i32, i32) {
    %c0_i32 = arith.constant 0 : i32
    %c0_i32_0 = arith.constant 0 : i32
    %c0_i32_1 = arith.constant 0 : i32
    return %c0_i32, %c0_i32_0 : i32, i32
  }
  func.func @transform_3(%arg0: i32) -> (i32, i32, i32) {
    %c0_i32 = arith.constant 0 : i32
    %c0_i32_0 = arith.constant 0 : i32
    %c0_i32_1 = arith.constant 0 : i32
    return %arg0, %c0_i32, %c0_i32_0 : i32, i32, i32
  }
}

</mosaic_0001>

<bundles_post_ra>
// kernel: tpu_custom_call.1
= control target key start
LH: loop header
LB: loop body
LE: loop exit
PB: predicated region body
PF: predicated region fallthrough
CT: control target
= control target key end

     0   :  { %8 = vsyncpa [#allocation3], 0  ;;  %s667_s0 = inlined_call_operand.hbm [shape: f32[2,8,32], index: 0, kind: input, shape index: {}]   ;;  %s668_s1 = inlined_call_operand.hbm [shape: f32[32,384], index: 1, kind: input, shape index: {}]   ;;  %s669_s2 = inlined_call_operand.vmem [shape: f32[1,384], index: 2, kind: input, shape index: {}]   ;;  %s670_s3 = inlined_call_operand.hbm [shape: f32[2,8,128], index: 3, kind: output, shape index: {}]  }
   0x1   :  { %9 = vsyncpa [#allocation6], 0 }
   0x2   :  { %10 = vsyncpa [#allocation4], 0  ;;  %s596_s12 = smov [#allocation2]  }
   0x3   :  { %s16_s13 = sshll.u32 %s596_s12, 4  ;;  %s17_s13 = int_to_ptr.vmem [resolvable:$true] %s16_s13 }
   0x4   :  { %s538_s14 = scalar_lea.vmem %s17_s13, 256  ;;  %p543_p1 = scmp.lt.s32.totalorder %s17_s13, %s17_s13 }
   0x5   :  { %p539_p0 = scmp.ne.s32.totalorder %s17_s13, %s538_s14  ;;  %p544_p2 = scmp.lt.s32.totalorder %s538_s14, %s538_s14 }
   0x7   :  { %p545_p3 = por %p544_p2, %p543_p1 }
   0x9   :  { %p546_p4 = pnand %p545_p3, %p539_p0 }
   0xb   :  { %549 = shalt.err (!%p546_p4)
}
   0xc   :  { %s597_s15 = smov 128   ;;  %s598_s16 = smov 8  }
   0xd   :  { %22 = dma.hbm_to_vmem [thread:$0]  %s667_s0, 256, %s17_s13, [#allocation3], %s597_s15, %s597_s15, %s598_s16  }
   0xe   :  { %s599_s19 = smov [#allocation5]  }
   0xf   :  { %s28_s20 = sshll.u32 %s599_s19, 4  ;;  %s29_s20 = int_to_ptr.vmem [resolvable:$true] %s28_s20 }
  0x10   :  { %s558_s21 = scalar_lea.vmem %s29_s20, 1536  ;;  %p563_p6 = scmp.lt.s32.totalorder %s29_s20, %s29_s20 }
  0x11   :  { %p559_p5 = scmp.ne.s32.totalorder %s29_s20, %s558_s21  ;;  %p564_p7 = scmp.lt.s32.totalorder %s558_s21, %s558_s21 }
  0x13   :  { %p565_p8 = por %p564_p7, %p563_p6 }
  0x15   :  { %p566_p9 = pnand %p565_p8, %p559_p5 }
  0x17   :  { %569 = shalt.err (!%p566_p9)
}
  0x18   :  { %s600_s22 = smov 384   ;;  %s601_s23 = smov 24  }
  0x19   :  { %34 = dma.hbm_to_vmem [thread:$0]  %s668_s1, 1536, %s29_s20, [#allocation6], %s600_s22, %s600_s22, %s601_s23  }
  0x1a   :  { %590 = dma.done.wait [#allocation3], 256  }
  0x1b   :  { %591 = vsyncadd [#allocation3], 4294967040 }
  0x1c   :  { %592 = dma.done.wait [#allocation6], 1536  }
  0x1d   :  { %593 = vsyncadd [#allocation6], 4294965760  ;;  %v602_v0 = vmov 0.0   ;;  %v56_v1 = vld [vmem:[#allocation5 + $0x50] sm:$0xff]  ;;  %v55_v2 = vld [vmem:[#allocation5 + $0x48] sm:$0xff]  ;;  %vm75_vm0 = vcmask 261120   ;;  %v60_v15 = vlaneseq }
  0x1e   :  { %146 = vmatprep.mubr.f32.mxu0 %v602_v0  ;;  %v53_v3 = vld [vmem:[#allocation5 + $0x38] sm:$0xff]  ;;  %106 = vmatprep.subr.mxu0 %v56_v1  ;;  %v52_v4 = vld [vmem:[#allocation5 + $0x30] sm:$0xff]  ;;  %v50_v5 = vld [vmem:[#allocation5 + $0x20] sm:$0xff]  ;;  %vm603_vm1 = vmmov 0   ;;  %vm348_vm2 = vcmask 1043456   ;;  %vm318_vm3 = vcmask 64512  }
  0x1f   :  { %107 = vmatpush1.msra.mxu0 %v55_v2  ;;  %v44_v6 = vld [vmem:[#allocation2] sm:$0xff]  ;;  %v49_v7 = vld [vmem:[#allocation5 + $0x18] sm:$0xff]  ;;  %v47_v8 = vld [vmem:[#allocation5 + $0x8] sm:$0xff]  ;;  %v61_v16 = vshrl.u32 %v60_v15, 7 }
  0x20   :  { %108 = vmatprep.subr.mxu0 %v53_v3  ;;  %486 = vmatprep.mubr.msk.f32.mxu1 %vm75_vm0, %v44_v6  ;;  %v46_v9 = vld [vmem:[#allocation5] sm:$0xff]  ;;  %v45_v10 = vld [vmem:[#allocation2 + $0x8] sm:$0xff]  ;;  %v51_v13 = vld [vmem:[#allocation5 + $0x28] sm:$0xff] }
  0x21   :  { %109 = vmatpush1.msra.mxu0 %v52_v4  ;;  %v57_v11 = vld [vmem:[#allocation5 + $0x58] sm:$0xff]  ;;  %v54_v12 = vld [vmem:[#allocation5 + $0x40] sm:$0xff]  ;;  %v48_v14 = vld [vmem:[#allocation5 + $0x10] sm:$0xff]  ;;  %v66_v17 = vsub.s32 1, %v61_v16  ;;  %v62_v20 = vsub.s32 0, %v61_v16  ;;  %v70_v34 = vsub.s32 2, %v61_v16 }
  0x22   :  { %110 = vmatprep.subr.mxu0 %v50_v5  ;;  %478 = vmatprep.subr.mxu1 %v57_v11  ;;  %v58_v18 = vld [vmem:[%s669_s2] sm:$0x7]  ;;  %s604_s2 = smov [#allocation7]  }
  0x23   :  { %111 = vmatpush1.msra.mxu0 %v49_v7  ;;  %479 = vmatpush3.msra.mxu1 %v57_v11  ;;  %v67_v19 = vrot.slane %v58_v18, %v66_v17  ;;  %v63_v24 = vrot.slane %v58_v18, %v62_v20  ;;  %v71_v35 = vrot.slane %v58_v18, %v70_v34  ;;  %s445_s26 = sshll.u32 %s604_s2, 4  ;;  %s446_s26 = int_to_ptr.vmem [resolvable:$true] %s445_s26 }
  0x24   :  { %112 = vmatprep.subr.mxu0 %v47_v8  ;;  %480 = vmatprep.subr.mxu1 %v54_v12  ;;  %s570_s27 = scalar_lea.vmem %s446_s26, 256  ;;  %p575_p11 = scmp.lt.s32.totalorder %s446_s26, %s446_s26 }
  0x25   :  { %113 = vmatpush1.msra.mxu0 %v46_v9  ;;  %481 = vmatpush3.msra.mxu1 %v54_v12  ;;  %p571_p10 = scmp.ne.s32.totalorder %s446_s26, %s570_s27  ;;  %p576_p12 = scmp.lt.s32.totalorder %s570_s27, %s570_s27 }
  0x26   :  { %458 = vmatmul.mubr.msk.f32.vlgmr.msra.gmra.mxu0 %vm75_vm0, %v44_v6  ;;  %489 = vmatprep.subr.bf16.mxu0 %v602_v0 }
  0x27   :  { %152 = vmatprep.mubr.f32.mxu0 %v602_v0  ;;  %482 = vmatprep.subr.mxu1 %v51_v13  ;;  %p577_p13 = por %p576_p12, %p575_p11 }
  0x28   :  { %483 = vmatpush3.msra.mxu1 %v51_v13 }
  0x29   :  { %484 = vmatprep.subr.mxu1 %v48_v14  ;;  %p578_p0 = pnand %p577_p13, %p571_p10 }
  0x2a   :  { %459 = vmatmul.mubr.msk.f32.gmra.mxu0 %vm75_vm0, %v45_v10  ;;  %485 = vmatpush3.msra.mxu1 %v48_v14 }
  0x2b   :  { %487 = vmatmul.mubr.msk.f32.vlgmr.msra.gmra.mxu1 %vm75_vm0, %v45_v10  ;;  %495 = vmatprep.subr.bf16.mxu1 %v602_v0 }
  0x2c   :  { %491 = vmatprep.mubr.msk.bf16.mxu0 %vm603_vm1, %v602_v0  ;;  %497 = vmatprep.mubr.msk.bf16.mxu1 %vm603_vm1, %v602_v0 }
  0xe6   :  { %v148_v21 = vpop.f32.mrf.mxu0 }
  0xe7   :  { %v149_v29 = vadd.f32 %v148_v21, %v63_v24 }
  0xe8   :  { %v150_v22 = vpop.f32.mrf.mxu0 }
  0xe9   :  { %v151_v23 = vadd.f32 %v150_v22, %v67_v19  ;;  %v234_v31 = vpack.c.bf16 %v149_v29, %v149_v29 }
  0xea   :  { %v154_v25 = vpop.f32.mrf.mxu0 }
  0xeb   :  { %v236_v26 = vpack.c.bf16 %v151_v23, %v151_v23  ;;  %v155_v32 = vadd.f32 %v154_v25, %v63_v24  ;;  %v488_v36 = vpop.f32.mrf.mxu1 }
  0xec   :  { %v156_v27 = vpop.f32.mrf.mxu0  ;;  %v231_v37 = vadd.f32 %v488_v36, %v71_v35 }
  0xed   :  { %v157_v28 = vadd.f32 %v156_v27, %v67_v19  ;;  %490 = vmatpush3.bf16.xpose.msra.mxu0 %v236_v26  ;;  %v235_v33 = vpack.c.bf16 %v155_v32, %v155_v32  ;;  %v225_v38 = vpop.f32.mrf.mxu1 }
  0xee   :  { %501 = vmatprep.subr.bf16.mxu0 %v602_v0  ;;  %v344_v39 = vpack.c.bf16 %v231_v37, %v231_v37  ;;  %v226_v40 = vadd.f32 %v225_v38, %v71_v35 }
  0xef   :  { %v237_v30 = vpack.c.bf16 %v157_v28, %v157_v28 }
  0xf0   :  { %v396_v41 = vsel %vm348_vm2, %v344_v39, 0  ;;  %v343_v42 = vpack.c.bf16 %v226_v40, %v226_v40 }
  0xf1   :  { %496 = vmatpush3.bf16.xpose.msra.mxu1 %v237_v30 }
  0xf2   :  { %507 = vmatprep.subr.bf16.mxu1 %v602_v0  ;;  %v350_v43 = vsel %vm348_vm2, %v343_v42, 0 }
  0xf4   :  { %492 = vmatmul.mubr.bf16.vlgmr.msra.gmra.mxu0 %v234_v31 }
  0xf5   :  { %503 = vmatprep.mubr.msk.bf16.mxu0 %vm603_vm1, %v602_v0  ;;  %502 = vmatpush3.bf16.msra.mxu0 %v350_v43 }
  0xf8   :  { %498 = vmatmul.mubr.bf16.vlgmr.msra.gmra.mxu1 %v235_v33 }
  0xf9   :  { %509 = vmatprep.mubr.msk.bf16.mxu1 %vm603_vm1, %v602_v0  ;;  %508 = vmatpush3.bf16.msra.mxu1 %v396_v41 }
 0x1b4   :  { %v272_v44 = vpop.f32.mrf.mxu0 }
 0x1b5   :  { %v319_v45 = vsel %vm318_vm3, %v272_v44, -inf }
 0x1b6   :  { %320 = vmax.xlane.f32.xlu0 %v319_v45  ;;  %v493_v46 = vpop.f32.mrf.mxu0 }
 0x1b8   :  { %v275_v47 = vpop.f32.mrf.mxu0  ;;  %v312_v48 = vpop.f32.mrf.mxu1 }
 0x1b9   :  { %v322_v49 = vsel %vm318_vm3, %v312_v48, -inf }
 0x1ba   :  { %v499_v50 = vpop.f32.mrf.mxu1  ;;  %323 = vmax.xlane.f32.xlu0 %v322_v49  ;;  %v494_v51 = vpop.f32.mrf.mxu0 }
 0x1bc   :  { %v315_v52 = vpop.f32.mrf.mxu1 }
 0x1be   :  { %v500_v53 = vpop.f32.mrf.mxu1 }
 0x23f   :  { %v321_v54 = vpop.xlane.xlu0 %320 }
 0x240   :  { %v325_v55 = vsub.f32 %v272_v44, %v321_v54 }
 0x242   :  { %v327_v56 = vmul.f32 1.442695, %v325_v55 }
 0x243   :  { %v324_v57 = vpop.xlane.xlu0 %323 }
 0x244   :  { %522 = vpow2.f32 %v327_v56  ;;  %v326_v58 = vsub.f32 %v312_v48, %v324_v57 }
 0x246   :  { %v329_v59 = vmul.f32 1.442695, %v326_v58 }
 0x248   :  { %524 = vpow2.f32 %v329_v59 }
 0x251   :  { %v523_v60 = vpop.eup %522 }
 0x252   :  { %v331_v61 = vsel %vm318_vm3, %v523_v60, 0.0 }
 0x253   :  { %332 = vadd.xlane.f32.xlu1 %v331_v61 }
 0x255   :  { %v525_v62 = vpop.eup %524 }
 0x256   :  { %v334_v63 = vsel %vm318_vm3, %v525_v62, 0.0 }
 0x257   :  { %335 = vadd.xlane.f32.xlu1 %v334_v63 }
 0x2dc   :  { %v333_v0 = vpop.xlane.xlu1 %332 }
 0x2dd   :  { %526 = vrcp.f32 %v333_v0 }
 0x2e0   :  { %v336_v1 = vpop.xlane.xlu1 %335 }
 0x2e1   :  { %528 = vrcp.f32 %v336_v1 }
 0x2ea   :  { %v527_v2 = vpop.eup %526 }
 0x2eb   :  { %v339_v3 = vmul.f32 %v527_v2, %v523_v60 }
 0x2ed   :  { %v341_v4 = vpack.c.bf16 %v339_v3, %v339_v3 }
 0x2ee   :  { %v529_v5 = vpop.eup %528 }
 0x2ef   :  { %504 = vmatmul.mubr.msk.bf16.vlgmr.msra.gmra.mxu0 %vm318_vm3, %v341_v4  ;;  %v340_v6 = vmul.f32 %v529_v5, %v525_v62 }
 0x2f1   :  { %v342_v7 = vpack.c.bf16 %v340_v6, %v340_v6 }
 0x2f3   :  { %510 = vmatmul.mubr.msk.bf16.vlgmr.msra.gmra.mxu1 %vm318_vm3, %v342_v7 }
 0x3af   :  { %v386_v8 = vpop.f32.mrf.mxu0 }
 0x3b0   :  { %438 = vst [vmem:[#allocation7] sm:$0xff] %v386_v8 }
 0x3b1   :  { %v505_v9 = vpop.f32.mrf.mxu0 }
 0x3b3   :  { %v389_v10 = vpop.f32.mrf.mxu0  ;;  %v432_v11 = vpop.f32.mrf.mxu1 }
 0x3b4   :  { %439 = vst [vmem:[#allocation7 + $0x8] sm:$0xff] %v432_v11 }
 0x3b5   :  { %v506_v12 = vpop.f32.mrf.mxu0  ;;  %v511_v13 = vpop.f32.mrf.mxu1 }
 0x3b6   :  { %581 = shalt.err (!%p578_p0)
}
 0x3b7   :  { %451 = dma.vmem_to_hbm [thread:$0]  %s446_s26, 256, %s670_s3, [#allocation4], %s597_s15, %s597_s15, %s598_s16   ;;  %v435_v14 = vpop.f32.mrf.mxu1 }
 0x3b9   :  { %v512_v15 = vpop.f32.mrf.mxu1 }
 0x3ba   :  { %594 = dma.done.wait [#allocation4], 256  }
 0x3bb   :  { %595 = vsyncadd [#allocation4], 4294967040 }
 0x3bc   :  { %455 = vsyncpa [#allocation3], 1 }
 0x3bd   :  { %456 = vsyncpa [#allocation6], 1 }
 0x3be   :  { %457 = vsyncpa [#allocation4], 1 }

</bundles_post_ra>
